<compile_context>
chip_gen: v7x
topology: tpu7x:2x2x1
jax: 0.10.0
libtpu: 0.0.40
codegen_flags: <defaults>
</compile_context>

<pallas_src>
import jax
import jax.numpy as jnp
from jax.experimental import pallas as pl
from jax.experimental.pallas import tpu as pltpu


def _make_aggregation_kernel(nother, fuse_weights):
    fw = [float(w) for w in fuse_weights]   # static module config -> constants

    def kernel(tgt_ref, others_ref, w_ref, o_ref):
        """One output view per grid step (leading view axis squeezed away).

        tgt_ref    : VMEM (NC, HW)          f32  -- target view, flattened
        others_ref : VMEM (nother, NC, HW)  f32  -- the other views, ascending order
        w_ref      : VMEM (nother, HW, HW)  bf16 -- FC weights 3i .. 3i+2
        o_ref      : VMEM (NC, HW)               -- output view, flattened
        """
        # Target view scaled by fuse weight 0 (f32 accumulation in vregs).
        acc = fw[0] * tgt_ref[...].astype(jnp.float32)

        # Statically unrolled loop over the "other" views: 3 MXU matmuls/step,
        # each (8,256) x (256,256) with f32 accumulation.
        for j in range(nother):
            lhs = others_ref[j].astype(w_ref.dtype)      # bf16 LHS for the MXU
            acc = acc + fw[j + 1] * jnp.dot(
                lhs, w_ref[j], preferred_element_type=jnp.float32)

        o_ref[...] = acc.astype(o_ref.dtype)

    return kernel


def aggregation_forward(inputs, fc_weights, fuse_weights):
    """inputs: list of nviews arrays (N,C,H,W); fc_weights: (nviews*(nviews-1), HW, HW)."""
    nviews = len(inputs)
    nother = nviews - 1
    N, C, H, W = inputs[0].shape
    NC, HW = N * C, H * W
    out_dtype = inputs[0].dtype

    # (nviews, N*C, H*W): NC=8 on sublanes (one f32 vreg), HW=256 on lanes
    # (lane-dense, multiple of 128 -> unmasked vst).
    views = jnp.stack([x.reshape(NC, HW) for x in inputs], axis=0)

    # Per-target "other" views in ascending order (matches FC index order 0..11).
    # Tiny host-side gather (96 KiB) so the kernel only needs static indexing.
    other_idx = jnp.asarray(
        [[j for j in range(nviews) if j != i] for i in range(nviews)], jnp.int32)
    others = views[other_idx]                         # (nviews, nother, NC, HW)

    # bf16 weights: halves the dominant HBM weight stream; f32 MXU accumulation
    # keeps the error to weight/activation quantization only.
    w_bf16 = jnp.asarray(fc_weights, jnp.bfloat16).reshape(nviews, nother, HW, HW)

    cost = pl.CostEstimate(
        flops=2 * nviews * nother * NC * HW * HW,     # ~12.6 MFLOP
        transcendentals=0,
        bytes_accessed=(w_bf16.size * w_bf16.dtype.itemsize
                        + views.size * views.dtype.itemsize
                        + others.size * others.dtype.itemsize
                        + views.size * views.dtype.itemsize),
    )

    out = pl.pallas_call(
        _make_aggregation_kernel(nother, fuse_weights),
        out_shape=jax.ShapeDtypeStruct((nviews, NC, HW), out_dtype),
        grid_spec=pltpu.PrefetchScalarGridSpec(
            num_scalar_prefetch=0,
            grid=(nviews,),                           # one grid step per output view
            in_specs=[
                # Target view i (leading view dim squeezed out of the kernel ref).
                pl.BlockSpec((None, NC, HW), lambda i: (i, 0, 0)),
                # Its 3 "other" views.
                pl.BlockSpec((None, nother, NC, HW), lambda i: (i, 0, 0, 0)),
                # Its 3 FC weights (rows 3i .. 3i+2 of the original weight stack).
                pl.BlockSpec((None, nother, HW, HW), lambda i: (i, 0, 0, 0)),
            ],
            out_specs=pl.BlockSpec((None, NC, HW), lambda i: (i, 0, 0)),
        ),
        compiler_params=pltpu.CompilerParams(
            dimension_semantics=("parallel",)),       # shard views across TCs on v7x
        cost_estimate=cost,
    )(views, others, w_bf16)

    return [out[i].reshape(N, C, H, W) for i in range(nviews)]


if __name__ == "__main__":
    # Small shapes consistent with the module: 4 views, heatmap size 16 -> FC of 256x256.
    N, C, H, W = 2, 4, 16, 16
    nviews = 4
    NUM_NETS = nviews * (nviews - 1)  # 12, as in the module
    HW = H * W

    key = jax.random.PRNGKey(0)
    k_in, k_w = jax.random.split(key)

    inputs = [
        jax.random.normal(jax.random.fold_in(k_in, i), (N, C, H, W), jnp.float32)
        for i in range(nviews)
    ]
    # ChannelWiseFC weights init: uniform_(0, 0.1), deterministic.
    fc_weights = jax.random.uniform(
        k_w, (NUM_NETS, HW, HW), jnp.float32, minval=0.0, maxval=0.1)
    fuse_weights = [0.4, 0.2, 0.2, 0.2]

    outs = aggregation_forward(inputs, fc_weights, fuse_weights)
    outs = [jax.block_until_ready(o) for o in outs]

    # Pure-JAX high-precision reference (module semantics).  The kernel's bf16
    # weight/activation cast in the matmul introduces ~1e-3 abs deviation;
    # tolerance reflects that while still catching any structural/indexing bug.
    flat = [x.reshape(N * C, HW) for x in inputs]
    index = 0
    for i in range(nviews):
        ref = fuse_weights[0] * flat[i]
        pos = 1
        for j in range(nviews):
            if j == i:
                continue
            ref = ref + fuse_weights[pos] * jnp.matmul(
                flat[j], fc_weights[index], precision=jax.lax.Precision.HIGHEST)
            index += 1
            pos += 1
        got = outs[i].reshape(N * C, HW)
        assert jnp.allclose(ref, got, atol=2e-2, rtol=2e-2), f"mismatch for view {i}"

    print("KERNEL_OK")
</pallas_src>

<mosaic_0001>
module attributes {stable_mosaic.version = 11 : i64} {
  func.func @kernel(%arg0: i32, %arg1: memref<1x8x256xf32, #tpu.memory_space<vmem>>, %arg2: memref<1x3x8x256xf32, #tpu.memory_space<vmem>>, %arg3: memref<1x3x256x256xbf16, #tpu.memory_space<vmem>>, %arg4: memref<1x8x256xf32, #tpu.memory_space<vmem>>) attributes {dimension_semantics = [#tpu.dimension_semantics<parallel>], iteration_bounds = array<i64: 4>, scalar_prefetch = 0 : i64, scratch_operands = 0 : i64, tpu.core_type = #tpu.core_type<tc>, window_params = [{transform_indices = @transform_0, window_bounds = array<i64: 1, 8, 256>}, {transform_indices = @transform_1, window_bounds = array<i64: 1, 3, 8, 256>}, {transform_indices = @transform_2, window_bounds = array<i64: 1, 3, 256, 256>}, {transform_indices = @transform_3, window_bounds = array<i64: 1, 8, 256>}]} {
    %c0 = arith.constant 0 : index
    %c0_0 = arith.constant 0 : index
    %c0_1 = arith.constant 0 : index
    %0 = vector.load %arg1[%c0, %c0_0, %c0_1] : memref<1x8x256xf32, #tpu.memory_space<vmem>>, vector<1x8x256xf32>
    %1 = vector.shape_cast %0 : vector<1x8x256xf32> to vector<8x256xf32>
    %cst = arith.constant 4.000000e-01 : f32
    %2 = vector.broadcast %cst : f32 to vector<8x256xf32>
    %3 = arith.mulf %2, %1 : vector<8x256xf32>
    %c0_2 = arith.constant 0 : index
    %c0_3 = arith.constant 0 : index
    %c0_4 = arith.constant 0 : index
    %c0_5 = arith.constant 0 : index
    %4 = vector.load %arg2[%c0_2, %c0_3, %c0_4, %c0_5] : memref<1x3x8x256xf32, #tpu.memory_space<vmem>>, vector<1x1x8x256xf32>
    %5 = vector.shape_cast %4 : vector<1x1x8x256xf32> to vector<8x256xf32>
    %6 = arith.truncf %5 : vector<8x256xf32> to vector<8x256xbf16>
    %c0_6 = arith.constant 0 : index
    %c0_7 = arith.constant 0 : index
    %c0_8 = arith.constant 0 : index
    %c0_9 = arith.constant 0 : index
    %7 = vector.load %arg3[%c0_6, %c0_7, %c0_8, %c0_9] : memref<1x3x256x256xbf16, #tpu.memory_space<vmem>>, vector<1x1x256x256xbf16>
    %8 = vector.shape_cast %7 : vector<1x1x256x256xbf16> to vector<256x256xbf16>
    %cst_10 = arith.constant dense<0.000000e+00> : vector<8x256xf32>
    %9 = tpu.matmul %6, %8, %cst_10 {dimension_numbers = #tpu.dot_dimension_numbers<[1], [0], [0], [1], [0, 0, 1, 1], [], []>} : vector<8x256xbf16>, vector<256x256xbf16>, vector<8x256xf32> -> vector<8x256xf32>
    %cst_11 = arith.constant 2.000000e-01 : f32
    %10 = vector.broadcast %cst_11 : f32 to vector<8x256xf32>
    %11 = arith.mulf %10, %9 : vector<8x256xf32>
    %12 = arith.addf %3, %11 : vector<8x256xf32>
    %c0_12 = arith.constant 0 : index
    %c1 = arith.constant 1 : index
    %c0_13 = arith.constant 0 : index
    %c0_14 = arith.constant 0 : index
    %13 = vector.load %arg2[%c0_12, %c1, %c0_13, %c0_14] : memref<1x3x8x256xf32, #tpu.memory_space<vmem>>, vector<1x1x8x256xf32>
    %14 = vector.shape_cast %13 : vector<1x1x8x256xf32> to vector<8x256xf32>
    %15 = arith.truncf %14 : vector<8x256xf32> to vector<8x256xbf16>
    %c0_15 = arith.constant 0 : index
    %c1_16 = arith.constant 1 : index
    %c0_17 = arith.constant 0 : index
    %c0_18 = arith.constant 0 : index
    %16 = vector.load %arg3[%c0_15, %c1_16, %c0_17, %c0_18] : memref<1x3x256x256xbf16, #tpu.memory_space<vmem>>, vector<1x1x256x256xbf16>
    %17 = vector.shape_cast %16 : vector<1x1x256x256xbf16> to vector<256x256xbf16>
    %cst_19 = arith.constant dense<0.000000e+00> : vector<8x256xf32>
    %18 = tpu.matmul %15, %17, %cst_19 {dimension_numbers = #tpu.dot_dimension_numbers<[1], [0], [0], [1], [0, 0, 1, 1], [], []>} : vector<8x256xbf16>, vector<256x256xbf16>, vector<8x256xf32> -> vector<8x256xf32>
    %cst_20 = arith.constant 2.000000e-01 : f32
    %19 = vector.broadcast %cst_20 : f32 to vector<8x256xf32>
    %20 = arith.mulf %19, %18 : vector<8x256xf32>
    %21 = arith.addf %12, %20 : vector<8x256xf32>
    %c0_21 = arith.constant 0 : index
    %c2 = arith.constant 2 : index
    %c0_22 = arith.constant 0 : index
    %c0_23 = arith.constant 0 : index
    %22 = vector.load %arg2[%c0_21, %c2, %c0_22, %c0_23] : memref<1x3x8x256xf32, #tpu.memory_space<vmem>>, vector<1x1x8x256xf32>
    %23 = vector.shape_cast %22 : vector<1x1x8x256xf32> to vector<8x256xf32>
    %24 = arith.truncf %23 : vector<8x256xf32> to vector<8x256xbf16>
    %c0_24 = arith.constant 0 : index
    %c2_25 = arith.constant 2 : index
    %c0_26 = arith.constant 0 : index
    %c0_27 = arith.constant 0 : index
    %25 = vector.load %arg3[%c0_24, %c2_25, %c0_26, %c0_27] : memref<1x3x256x256xbf16, #tpu.memory_space<vmem>>, vector<1x1x256x256xbf16>
    %26 = vector.shape_cast %25 : vector<1x1x256x256xbf16> to vector<256x256xbf16>
    %cst_28 = arith.constant dense<0.000000e+00> : vector<8x256xf32>
    %27 = tpu.matmul %24, %26, %cst_28 {dimension_numbers = #tpu.dot_dimension_numbers<[1], [0], [0], [1], [0, 0, 1, 1], [], []>} : vector<8x256xbf16>, vector<256x256xbf16>, vector<8x256xf32> -> vector<8x256xf32>
    %cst_29 = arith.constant 2.000000e-01 : f32
    %28 = vector.broadcast %cst_29 : f32 to vector<8x256xf32>
    %29 = arith.mulf %28, %27 : vector<8x256xf32>
    %30 = arith.addf %21, %29 : vector<8x256xf32>
    %c0_30 = arith.constant 0 : index
    %c0_31 = arith.constant 0 : index
    %c0_32 = arith.constant 0 : index
    %31 = vector.load %arg4[%c0_30, %c0_31, %c0_32] : memref<1x8x256xf32, #tpu.memory_space<vmem>>, vector<1x8x256xf32>
    %32 = vector.shape_cast %31 : vector<1x8x256xf32> to vector<8x256xf32>
    %33 = vector.shape_cast %30 : vector<8x256xf32> to vector<1x8x256xf32>
    tpu.vector_store %arg4[%c0_30, %c0_31, %c0_32], %33 {strides = array<i32>} : memref<1x8x256xf32, #tpu.memory_space<vmem>>, vector<1x8x256xf32>,
    return
  }
  func.func @transform_0(%arg0: i32) -> (i32, i32, i32) {
    %c0_i32 = arith.constant 0 : i32
    %c0_i32_0 = arith.constant 0 : i32
    %c0_i32_1 = arith.constant 0 : i32
    return %arg0, %c0_i32, %c0_i32_0 : i32, i32, i32
  }
  func.func @transform_1(%arg0: i32) -> (i32, i32, i32, i32) {
    %c0_i32 = arith.constant 0 : i32
    %c0_i32_0 = arith.constant 0 : i32
    %c0_i32_1 = arith.constant 0 : i32
    %c0_i32_2 = arith.constant 0 : i32
    return %arg0, %c0_i32, %c0_i32_0, %c0_i32_1 : i32, i32, i32, i32
  }
  func.func @transform_2(%arg0: i32) -> (i32, i32, i32, i32) {
    %c0_i32 = arith.constant 0 : i32
    %c0_i32_0 = arith.constant 0 : i32
    %c0_i32_1 = arith.constant 0 : i32
    %c0_i32_2 = arith.constant 0 : i32
    return %arg0, %c0_i32, %c0_i32_0, %c0_i32_1 : i32, i32, i32, i32
  }
  func.func @transform_3(%arg0: i32) -> (i32, i32, i32) {
    %c0_i32 = arith.constant 0 : i32
    %c0_i32_0 = arith.constant 0 : i32
    %c0_i32_1 = arith.constant 0 : i32
    return %arg0, %c0_i32, %c0_i32_0 : i32, i32, i32
  }
}

</mosaic_0001>

<bundles_post_ra>
// kernel: tpu_custom_call.1
= control target key start
LH: loop header
LB: loop body
LE: loop exit
PB: predicated region body
PF: predicated region fallthrough
CT: control target
= control target key end

     0   :  { %8 = vsyncpa [#allocation3], 0  ;;  %s2058_s0 = inlined_call_operand.hbm [shape: f32[4,8,256], index: 0, kind: input, shape index: {}]   ;;  %s2059_s1 = inlined_call_operand.hbm [shape: f32[4,3,8,256], index: 1, kind: input, shape index: {}]   ;;  %s2060_s2 = inlined_call_operand.hbm [shape: bf16[4,3,256,256], index: 2, kind: input, shape index: {}]   ;;  %s2061_s3 = inlined_call_operand.hbm [shape: f32[4,8,256], index: 3, kind: output, shape index: {}]  }
   0x1   :  { %10 = vsyncpa [#allocation3 + $0x1], 0 }
   0x2   :  { %11 = vsyncpa [#allocation6], 0 }
   0x3   :  { %13 = vsyncpa [#allocation6 + $0x1], 0 }
   0x4   :  { %14 = vsyncpa [#allocation4], 0 }
   0x5   :  { %16 = vsyncpa [#allocation4 + $0x1], 0  ;;  %s1707_s12 = smov 0   ;;  %s1709_s13 = smov 0  }
   0x6   :  { %s1711_s14 = smov 0   ;;  %s1713_s15 = smov 0  }
   0x7 LB: > { %s1728_s16 = sadd.s32 4294967295, %s1677_s15   ;;  %s1125_s17 = sadd.s32 4294967294, %s1677_s15   ;;  %s1677_s15 = sphi %s1713_s15, %s2078_s15   ;;  %s1673_s14 = sphi %s1711_s14, %s2077_s14   ;;  %s1669_s13 = sphi %s1709_s13, %s2076_s13   ;;  %s1665_s12 = sphi %s1707_s12, %s2075_s12  }
   0x8   : > { %s1732_s18 = sadd.s32 1, %s1677_s15   ;;  %s29_s19 = sadd.s32 1, %s1673_s14 }
   0x9   : > { %s26_s20 = ssub.s32 %s1677_s15, %s1732_s18  ;;  %p36_p0 = scmp.ne.s32.totalorder %s1673_s14, %s1669_s13 }
   0xa   : > { %p27_p1 = scmp.eq.s32.totalorder %s26_s20, 0  ;;  %p37_p2 = scmp.eq.s32.totalorder %s1677_s15, 0 }
   0xb   : > { %p42_p3 = scmp.ne.s32.totalorder %s1669_s13, %s1665_s12  ;;  %p43_p4 = scmp.eq.s32.totalorder %s1728_s16, 0 }
   0xc   : > { %s1744_s21 = scalar_select %p27_p1, %s1673_s14, %s29_s19  }
   0xd   : > { %p38_p5 = por %p37_p2, %p36_p0  ;;  %p1746_p6 = por %p43_p4, %p42_p3 }
   0xe   : > { %p118_p7 = scmp.eq.s32.totalorder %s1728_s16, 3  ;;  %p124_p8 = scmp.eq.s32.totalorder %s1125_s17, 3 }
   0xf   : > { %s2064_s22 = scalar_select %p1746_p6, 1, 0 }
  0x10   : > { %p1335_p9 = scmp.lt.s32.totalorder %s1677_s15, 4  ;;  %p1752_p10 = por %p118_p7, %p36_p0 }
  0x11   : > { %p1756_p11 = por %p124_p8, %p42_p3  ;;  %s1761_s25 = sand.u32 1, %s1673_s14  }
  0x12   : > { %s2065_s23 = scalar_select %p1752_p10, 1, 0 }
  0x13   : > { %s2066_s24 = scalar_select %p1756_p11, 1, 0 }
  0x14   : > { %p1763_p12 = pnand %p1335_p9, %p38_p5  ;;  %s163_s27 = sand.u32 1, %s1677_s15  }
  0x15   : > { %s1307_s28 = smul.u32 48, %s1761_s25  ;;  %s1778_s8 = scalar_lea.sflag [#allocation6], %s163_s27 }
  0x16   : > { %s1308_s29 = smul.u32 768, %s1677_s15  ;;  %p1784_p1 = pneg %p1763_p12 }
  0x17   : > { %s167_s30 = scalar_lea.vmem [#allocation5], %s1307_s28  ;;  %s1522_s19 = scalar_lea.hbm %s2059_s1, 3072 }
  0x18   : > { %s174_s4 = sshll.u32 %s167_s30, 4  ;;  %s1773_s7 = scalar_lea.hbm %s2059_s1, %s1308_s29  ;;  %s1775_s4 = int_to_ptr.vmem [resolvable:$true] %s174_s4 }
  0x19   : > { %s1517_s9 = scalar_lea.hbm %s1773_s7, 768  ;;  %p1523_p4 = scmp.lt.u32.totalorder %s1773_s7, %s2059_s1 }
  0x1a   : > { %p1518_p0 = scmp.ne.s32.totalorder %s1773_s7, %s1517_s9  ;;  %p1524_p5 = scmp.lt.u32.totalorder %s1522_s19, %s1517_s9 }
  0x1b   : > { %p1526_p8 = scmp.lt.u32.totalorder %s1517_s9, %s1773_s7 }
  0x1c   : > { %p1520_p2 = pnand %p1784_p1, %p1518_p0  ;;  %p1525_p7 = por %p1524_p5, %p1523_p4 }
  0x1e   : > { %p1521_p3 = pneg %p1520_p2  ;;  %p1527_p9 = por %p1526_p8, %p1525_p7 }
  0x20   : > { %p1528_p13 = pnand %p1527_p9, %p1521_p3 }
  0x22   : > { %1531 = shalt.err (!%p1528_p13)
}
  0x23   : > { %s1532_s27 = scalar_lea.vmem %s1775_s4, 768  ;;  %s1679_s29 = smov [#allocation5]  }
  0x24   : > { %p1533_p0 = scmp.ne.s32.totalorder %s1775_s4, %s1532_s27  ;;  %s1537_s30 = sshll.u32 %s1679_s29, 4  ;;  %s1538_s30 = int_to_ptr.vmem [resolvable:$false] %s1537_s30 }
  0x25   : > { %s1539_s5 = scalar_lea.vmem %s1538_s30, 1536  ;;  %p1540_p10 = scmp.lt.s32.totalorder %s1775_s4, %s1538_s30 }
  0x26   : > { %p1535_p2 = pnand %p1533_p0, %p1784_p1  ;;  %p1541_p6 = scmp.lt.s32.totalorder %s1539_s5, %s1532_s27 }
  0x28   : > { %p1536_p11 = pneg %p1535_p2  ;;  %p1542_p4 = por %p1541_p6, %p1540_p10 }
  0x2a   : > { %p1543_p5 = pnand %p1542_p4, %p1536_p11 }
  0x2c   : > { %1546 = shalt.err (!%p1543_p5)
}
  0x2d   : > { %s1680_s6 = smov 256   ;;  %s1681_s9 = smov 16  }
  0x2e   : > { %1327 = dma.hbm_to_vmem [thread:$0]  (!%p1763_p12), %s1773_s7, 768, %s1775_s4, %s1778_s8, %s1680_s6, %s1680_s6, %s1681_s9  }
  0x2f   : > { %p203_p13 = scmp.lt.s32.totalorder %s1677_s15, 5  ;;  %s1128_s11 = sshll.u32 %s1761_s25, 4 }
  0x30   : > { %s1305_s17 = sshll.u32 %s1677_s15, 8  ;;  %p2069_p6 = scmp.ge.s32.totalorder %s1677_s15, 1 }
  0x31   : > { %s1820_s27 = scalar_lea.hbm %s2058_s0, %s1305_s17  ;;  %s148_s29 = scalar_lea.vmem [#allocation2], %s1128_s11 }
  0x32   : > { %p1813_p10 = pnand %p2069_p6, %p203_p13  ;;  %s156_s30 = sshll.u32 %s148_s29, 4  ;;  %s1822_s30 = int_to_ptr.vmem [resolvable:$true] %s156_s30 }
  0x33   : > { %s1309_s4 = smul.u32 768, %s1761_s25  ;;  %s145_s7 = scalar_lea.sflag [#allocation3], %s1761_s25 }
  0x34   : > { %s2070_s19 = scalar_select %p1813_p10, 1, 0 }
  0x35   : > { %s1547_s5 = scalar_lea.hbm %s1820_s27, 256  ;;  %s1552_s17 = scalar_lea.hbm %s2058_s0, 1024 }
  0x36   : > { %p1548_p11 = scmp.ne.s32.totalorder %s1820_s27, %s1547_s5  ;;  %p1553_p8 = scmp.lt.u32.totalorder %s1820_s27, %s2058_s0 }
  0x37   : > { %p1554_p9 = scmp.lt.u32.totalorder %s1552_s17, %s1547_s5  ;;  %p1556_p2 = scmp.lt.u32.totalorder %s1547_s5, %s1820_s27 }
  0x38   : > { %p1550_p3 = pnand %p1548_p11, %p1784_p1 }
  0x39   : > { %p1555_p0 = por %p1554_p9, %p1553_p8 }
  0x3a   : > { %p1551_p7 = pneg %p1550_p3 }
  0x3b   : > { %p1557_p4 = por %p1556_p2, %p1555_p0 }
  0x3d   : > { %p1558_p5 = pnand %p1557_p4, %p1551_p7 }
  0x3f   : > { %1561 = shalt.err (!%p1558_p5)
}
  0x40   : > { %s1562_s11 = scalar_lea.vmem %s1822_s30, 256  ;;  %s1682_s29 = smov [#allocation2]  }
  0x41   : > { %p1563_p13 = scmp.ne.s32.totalorder %s1822_s30, %s1562_s11  ;;  %s1567_s6 = sshll.u32 %s1682_s29, 4  ;;  %s1568_s6 = int_to_ptr.vmem [resolvable:$false] %s1567_s6 }
  0x42   : > { %s1569_s9 = scalar_lea.vmem %s1568_s6, 512  ;;  %p1570_p3 = scmp.lt.s32.totalorder %s1822_s30, %s1568_s6 }
  0x43   : > { %p1565_p6 = pnand %p1563_p13, %p1784_p1  ;;  %p1571_p10 = scmp.lt.s32.totalorder %s1569_s9, %s1562_s11 }
  0x45   : > { %p1566_p11 = pneg %p1565_p6  ;;  %p1572_p8 = por %p1571_p10, %p1570_p3 }
  0x47   : > { %p1573_p9 = pnand %p1572_p8, %p1566_p11 }
  0x49   : > { %1576 = shalt.err (!%p1573_p9)
}
  0x4a   : > { %1324 = dma.hbm_to_vmem [thread:$0]  (!%p1763_p12), %s1820_s27, 256, %s1822_s30, %s145_s7  }
  0x4b   : > { %s1310_s5 = smul.u32 12288, %s1677_s15  ;;  %s188_s17 = scalar_lea.vmem [#allocation7], %s1309_s4 }
  0x4c   : > { %s195_s20 = sshll.u32 %s188_s17, 4  ;;  %s1582_s30 = scalar_lea.hbm %s2060_s2, 49152  ;;  %s1855_s20 = int_to_ptr.vmem [resolvable:$true] %s195_s20 }
  0x4d   : > { %s1853_s6 = scalar_lea.hbm %s2060_s2, %s1310_s5 }
  0x4e   : > { %s1577_s11 = scalar_lea.hbm %s1853_s6, 12288  ;;  %p1583_p2 = scmp.lt.u32.totalorder %s1853_s6, %s2060_s2 }
  0x4f   : > { %p1578_p10 = scmp.ne.s32.totalorder %s1853_s6, %s1577_s11  ;;  %p1584_p4 = scmp.lt.u32.totalorder %s1582_s30, %s1577_s11 }
  0x50   : > { %p1586_p13 = scmp.lt.u32.totalorder %s1577_s11, %s1853_s6 }
  0x51   : > { %p1580_p7 = pnand %p1578_p10, %p1784_p1  ;;  %p1585_p5 = por %p1584_p4, %p1583_p2 }
  0x53   : > { %p1581_p0 = pneg %p1580_p7  ;;  %p1587_p6 = por %p1586_p13, %p1585_p5 }
  0x55   : > { %p1588_p11 = pnand %p1587_p6, %p1581_p0 }
  0x57   : > { %1591 = shalt.err (!%p1588_p11)
}
  0x58   : > { %s1592_s9 = scalar_lea.vmem %s1855_s20, 12288  ;;  %s1683_s5 = smov [#allocation7]  }
  0x59   : > { %p1593_p3 = scmp.ne.s32.totalorder %s1855_s20, %s1592_s9  ;;  %s1597_s17 = sshll.u32 %s1683_s5, 4  ;;  %s1598_s17 = int_to_ptr.vmem [resolvable:$false] %s1597_s17 }
  0x5a   : > { %s1599_s28 = scalar_lea.vmem %s1598_s17, 24576  ;;  %p1600_p10 = scmp.lt.s32.totalorder %s1855_s20, %s1598_s17 }
  0x5b   : > { %p1595_p8 = pnand %p1593_p3, %p1784_p1  ;;  %p1601_p7 = scmp.lt.s32.totalorder %s1599_s28, %s1592_s9 }
  0x5d   : > { %p1596_p9 = pneg %p1595_p8  ;;  %p1602_p2 = por %p1601_p7, %p1600_p10 }
  0x5f   : > { %p1603_p4 = pnand %p1602_p2, %p1596_p9 }
  0x61   : > { %1606 = shalt.err (!%p1603_p4)
}
  0x62   : > { %s1684_s29 = smov 128   ;;  %s1685_s11 = smov 8  }
  0x63   : > { %1330 = dma.hbm_to_vmem [thread:$0]  (!%p1763_p12), %s1853_s6, 12288, %s1855_s20, %s1778_s8, %s1684_s29, %s1684_s29, %s1685_s11  }
  0x64   : > { %p2071_p1 = scmp.ne.s32.totalorder %s2070_s19, 0 }
  0x65   : > { %s1882_s10 = sand.u32 (!%p2071_p1), 1, %s1669_s13   ;;  %p2072_p0 = scmp.ne.s32.totalorder (!%p2071_p1), %s2064_s22, 0 }
  0x66   : > { %207 = sbr.rel (%p2071_p1) target bundleno = 477 (0x1dd), region = 32  ;;  %s1134_s27 = sshll.u32 (!%p2071_p1), %s1882_s10, 4 }
  0x67   : > { %s210_s25 = scalar_lea.sflag (!%p2071_p1), [#allocation3], %s1882_s10  ;;  %s1888_s30 = scalar_lea.vmem (!%p2071_p1), [#allocation2], %s1134_s27 }
  0x6d   : > { %1652 = dma.done.wait (%p2072_p0), %s210_s25, 256  }
  0x6e   : > { %1654 = vsyncadd (%p2072_p0), %s210_s25, 4294967040  ;;  %s218_s26 = sand.u32 1, %s1728_s16   ;;  %s1311_s8 = smul.u32 48, %s1882_s10 }
  0x6f   : > { %s219_s19 = scalar_lea.sflag [#allocation6], %s218_s26 }
  0x70   : > { %s1896_s20 = scalar_lea.vmem [#allocation5], %s1311_s8 }
  0x71   : > { %1656 = dma.done.wait (%p2072_p0), %s219_s19, 13056  }
  0x72   : > { %1658 = vsyncadd (%p2072_p0), %s219_s19, 4294954240  ;;  %s1312_s6 = smul.u32 768, %s1882_s10  ;;  %v269_v46 = vld [vmem:[%s1896_s20 + $0x8] sm:$0xff]  ;;  %v1169_v50 = vld [vmem:[%s1896_s20 + $0x18] sm:$0xff]  ;;  %s1306_s22 = sshll.u32 %s1728_s16, 8 }
  0x73   : > { %v271_v48 = vpack.c.bf16 %v269_v46, %v269_v46  ;;  %v513_v52 = vpack.c.bf16 %v1169_v50, %v1169_v50  ;;  %s263_s7 = scalar_lea.vmem [#allocation8], %s1134_s27  ;;  %s2015_s28 = scalar_lea.hbm %s2061_s3, %s1306_s22 }
  0x74   : > { %s1903_s4 = scalar_lea.vmem [#allocation7], %s1312_s6  ;;  %s1012_s9 = sshll.u32 %s263_s7, 4  ;;  %s2017_s9 = int_to_ptr.vmem [resolvable:$true] %s1012_s9 }
  0x75   : > { %v1373_v0 = vld [vmem:[%s1903_s4 + $0x4] ss:$8 sps:$4 sm:$0xff]   ;;  %v1375_v1 = vld [vmem:[%s1903_s4] ss:$8 sps:$4 sm:$0xff]   ;;  %v1379_v4 = vld [vmem:[%s1903_s4 + $0x14] ss:$8 sps:$4 sm:$0xff]   ;;  %496 = vmatprep.mubr.bf16.mxu0 %v271_v48  ;;  %739 = vmatprep.mubr.bf16.mxu1 %v513_v52 }
  0x76   : > { %464 = vmatprep.subr.bf16.mxu0 %v1373_v0  ;;  %v1376_v2 = vld [vmem:[%s1903_s4 + $0x104] ss:$8 sps:$4 sm:$0xff]   ;;  %v1378_v3 = vld [vmem:[%s1903_s4 + $0x100] ss:$8 sps:$4 sm:$0xff]   ;;  %v1381_v5 = vld [vmem:[%s1903_s4 + $0x10] ss:$8 sps:$4 sm:$0xff]  }
  0x77   : > { %465 = vmatpush1.bf16.msra.mxu0 %v1375_v1  ;;  %707 = vmatprep.subr.bf16.mxu1 %v1376_v2  ;;  %v1382_v6 = vld [vmem:[%s1903_s4 + $0x114] ss:$8 sps:$4 sm:$0xff]   ;;  %v1384_v7 = vld [vmem:[%s1903_s4 + $0x110] ss:$8 sps:$4 sm:$0xff]   ;;  %v1385_v8 = vld [vmem:[%s1903_s4 + $0x24] ss:$8 sps:$4 sm:$0xff]  }
  0x78   : > { %708 = vmatpush1.bf16.msra.mxu1 %v1378_v3  ;;  %466 = vmatprep.subr.bf16.mxu0 %v1379_v4  ;;  %v1387_v9 = vld [vmem:[%s1903_s4 + $0x20] ss:$8 sps:$4 sm:$0xff]   ;;  %v1388_v10 = vld [vmem:[%s1903_s4 + $0x124] ss:$8 sps:$4 sm:$0xff]   ;;  %v1391_v11 = vld [vmem:[%s1903_s4 + $0x34] ss:$8 sps:$4 sm:$0xff]  }
  0x79   : > { %709 = vmatprep.subr.bf16.mxu1 %v1382_v6  ;;  %v1390_v12 = vld [vmem:[%s1903_s4 + $0x120] ss:$8 sps:$4 sm:$0xff]   ;;  %v1394_v13 = vld [vmem:[%s1903_s4 + $0x134] ss:$8 sps:$4 sm:$0xff]   ;;  %v1393_v14 = vld [vmem:[%s1903_s4 + $0x30] ss:$8 sps:$4 sm:$0xff]  }
  0x7a   : > { %v1397_v15 = vld [vmem:[%s1903_s4 + $0x44] ss:$8 sps:$4 sm:$0xff]   ;;  %v1396_v16 = vld [vmem:[%s1903_s4 + $0x130] ss:$8 sps:$4 sm:$0xff]   ;;  %v1399_v18 = vld [vmem:[%s1903_s4 + $0x40] ss:$8 sps:$4 sm:$0xff]  }
  0x7b   : > { %467 = vmatpush1.bf16.msra.mxu0 %v1381_v5  ;;  %v1400_v17 = vld [vmem:[%s1903_s4 + $0x144] ss:$8 sps:$4 sm:$0xff]   ;;  %v1403_v19 = vld [vmem:[%s1903_s4 + $0x54] ss:$8 sps:$4 sm:$0xff]   ;;  %v1402_v20 = vld [vmem:[%s1903_s4 + $0x140] ss:$8 sps:$4 sm:$0xff]  }
  0x7c   : > { %468 = vmatprep.subr.bf16.mxu0 %v1385_v8  ;;  %710 = vmatpush1.bf16.msra.mxu1 %v1384_v7  ;;  %v1406_v21 = vld [vmem:[%s1903_s4 + $0x154] ss:$8 sps:$4 sm:$0xff]   ;;  %v1405_v22 = vld [vmem:[%s1903_s4 + $0x50] ss:$8 sps:$4 sm:$0xff]   ;;  %v1409_v23 = vld [vmem:[%s1903_s4 + $0x64] ss:$8 sps:$4 sm:$0xff]  }
  0x7d   : > { %711 = vmatprep.subr.bf16.mxu1 %v1388_v10  ;;  %v1408_v24 = vld [vmem:[%s1903_s4 + $0x150] ss:$8 sps:$4 sm:$0xff]   ;;  %v1412_v25 = vld [vmem:[%s1903_s4 + $0x164] ss:$8 sps:$4 sm:$0xff]   ;;  %v1411_v26 = vld [vmem:[%s1903_s4 + $0x60] ss:$8 sps:$4 sm:$0xff]  }
  0x7e   : > { %v1415_v27 = vld [vmem:[%s1903_s4 + $0x74] ss:$8 sps:$4 sm:$0xff]   ;;  %v1414_v28 = vld [vmem:[%s1903_s4 + $0x160] ss:$8 sps:$4 sm:$0xff]   ;;  %v1417_v30 = vld [vmem:[%s1903_s4 + $0x70] ss:$8 sps:$4 sm:$0xff]  }
  0x7f   : > { %469 = vmatpush1.bf16.msra.mxu0 %v1387_v9  ;;  %v1418_v29 = vld [vmem:[%s1903_s4 + $0x174] ss:$8 sps:$4 sm:$0xff]   ;;  %v1421_v31 = vld [vmem:[%s1903_s4 + $0x84] ss:$8 sps:$4 sm:$0xff]   ;;  %v1420_v32 = vld [vmem:[%s1903_s4 + $0x170] ss:$8 sps:$4 sm:$0xff]  }
  0x80   : > { %470 = vmatprep.subr.bf16.mxu0 %v1391_v11  ;;  %712 = vmatpush1.bf16.msra.mxu1 %v1390_v12  ;;  %v1424_v33 = vld [vmem:[%s1903_s4 + $0x184] ss:$8 sps:$4 sm:$0xff]   ;;  %v1423_v34 = vld [vmem:[%s1903_s4 + $0x80] ss:$8 sps:$4 sm:$0xff]   ;;  %v1427_v35 = vld [vmem:[%s1903_s4 + $0x94] ss:$8 sps:$4 sm:$0xff]  }
  0x81   : > { %713 = vmatprep.subr.bf16.mxu1 %v1394_v13  ;;  %v1426_v36 = vld [vmem:[%s1903_s4 + $0x180] ss:$8 sps:$4 sm:$0xff]   ;;  %v1430_v37 = vld [vmem:[%s1903_s4 + $0x194] ss:$8 sps:$4 sm:$0xff]   ;;  %v1429_v38 = vld [vmem:[%s1903_s4 + $0x90] ss:$8 sps:$4 sm:$0xff]  }
  0x82   : > { %v1433_v39 = vld [vmem:[%s1903_s4 + $0xa4] ss:$8 sps:$4 sm:$0xff]   ;;  %v1432_v40 = vld [vmem:[%s1903_s4 + $0x190] ss:$8 sps:$4 sm:$0xff]   ;;  %v1435_v42 = vld [vmem:[%s1903_s4 + $0xa0] ss:$8 sps:$4 sm:$0xff]  }
  0x83   : > { %471 = vmatpush1.bf16.msra.mxu0 %v1393_v14  ;;  %v1436_v41 = vld [vmem:[%s1903_s4 + $0x1a4] ss:$8 sps:$4 sm:$0xff]   ;;  %v1439_v43 = vld [vmem:[%s1903_s4 + $0xb4] ss:$8 sps:$4 sm:$0xff]   ;;  %v1438_v44 = vld [vmem:[%s1903_s4 + $0x1a0] ss:$8 sps:$4 sm:$0xff]  }
  0x84   : > { %472 = vmatprep.subr.bf16.mxu0 %v1397_v15  ;;  %714 = vmatpush1.bf16.msra.mxu1 %v1396_v16  ;;  %v1442_v45 = vld [vmem:[%s1903_s4 + $0x1b4] ss:$8 sps:$4 sm:$0xff]   ;;  %v1441_v47 = vld [vmem:[%s1903_s4 + $0xb0] ss:$8 sps:$4 sm:$0xff]   ;;  %v1445_v49 = vld [vmem:[%s1903_s4 + $0xc4] ss:$8 sps:$4 sm:$0xff]  }
  0x85   : > { %715 = vmatprep.subr.bf16.mxu1 %v1400_v17  ;;  %v1444_v51 = vld [vmem:[%s1903_s4 + $0x1b0] ss:$8 sps:$4 sm:$0xff]   ;;  %v1448_v53 = vld [vmem:[%s1903_s4 + $0x1c4] ss:$8 sps:$4 sm:$0xff]   ;;  %v1447_v54 = vld [vmem:[%s1903_s4 + $0xc0] ss:$8 sps:$4 sm:$0xff]  }
  0x86   : > { %v1451_v55 = vld [vmem:[%s1903_s4 + $0xd4] ss:$8 sps:$4 sm:$0xff]   ;;  %v1450_v56 = vld [vmem:[%s1903_s4 + $0x1c0] ss:$8 sps:$4 sm:$0xff]   ;;  %v1453_v58 = vld [vmem:[%s1903_s4 + $0xd0] ss:$8 sps:$4 sm:$0xff]  }
  0x87   : > { %473 = vmatpush1.bf16.msra.mxu0 %v1399_v18  ;;  %v1454_v57 = vld [vmem:[%s1903_s4 + $0x1d4] ss:$8 sps:$4 sm:$0xff]   ;;  %v1457_v59 = vld [vmem:[%s1903_s4 + $0xe4] ss:$8 sps:$4 sm:$0xff]   ;;  %v1456_v60 = vld [vmem:[%s1903_s4 + $0x1d0] ss:$8 sps:$4 sm:$0xff]  }
  0x88   : > { %474 = vmatprep.subr.bf16.mxu0 %v1403_v19  ;;  %716 = vmatpush1.bf16.msra.mxu1 %v1402_v20  ;;  %v1460_v61 = vld [vmem:[%s1903_s4 + $0x1e4] ss:$8 sps:$4 sm:$0xff]   ;;  %v1459_v62 = vld [vmem:[%s1903_s4 + $0xe0] ss:$8 sps:$4 sm:$0xff]   ;;  %v1463_v63 = vld [vmem:[%s1903_s4 + $0xf4] ss:$8 sps:$4 sm:$0xff]  }
  0x89   : > { %717 = vmatprep.subr.bf16.mxu1 %v1406_v21  ;;  %v1462_v0 = vld [vmem:[%s1903_s4 + $0x1e0] ss:$8 sps:$4 sm:$0xff]   ;;  %v1465_v1 = vld [vmem:[%s1903_s4 + $0xf0] ss:$8 sps:$4 sm:$0xff]   ;;  %v1466_v2 = vld [vmem:[%s1903_s4 + $0x1f4] ss:$8 sps:$4 sm:$0xff]  }
  0x8a   : > { %v1468_v3 = vld [vmem:[%s1903_s4 + $0x1f0] ss:$8 sps:$4 sm:$0xff]   ;;  %v1471_v5 = vld [vmem:[%s1903_s4 + $0x204] ss:$8 sps:$4 sm:$0xff]   ;;  %v1469_v8 = vld [vmem:[%s1903_s4 + $0x200] ss:$8 sps:$4 sm:$0xff]  }
  0x8b   : > { %475 = vmatpush1.bf16.msra.mxu0 %v1405_v22  ;;  %v268_v4 = vld [vmem:[%s1896_s20] sm:$0xff]  ;;  %v1168_v6 = vld [vmem:[%s1896_s20 + $0x10] sm:$0xff]  ;;  %v1235_v11 = vld [vmem:[%s1896_s20 + $0x28] sm:$0xff]  ;;  %s998_s16 = scalar_lea.sflag [#allocation4], %s1882_s10  ;;  %s1607_s29 = scalar_lea.vmem %s2017_s9, 256 }
  0x8c   : > { %476 = vmatprep.subr.bf16.mxu0 %v1409_v23  ;;  %718 = vmatpush1.bf16.msra.mxu1 %v1408_v24  ;;  %v270_v7 = vpack.c.bf16 %v268_v4, %v268_v4  ;;  %v512_v9 = vpack.c.bf16 %v1168_v6, %v1168_v6  ;;  %v1474_v10 = vld [vmem:[%s1903_s4 + $0x214] ss:$8 sps:$4 sm:$0xff]   ;;  %v756_v12 = vpack.c.bf16 %v1235_v11, %v1235_v11  ;;  %v1472_v13 = vld [vmem:[%s1903_s4 + $0x210] ss:$8 sps:$4 sm:$0xff]   ;;  %v1477_v14 = vld [vmem:[%s1903_s4 + $0x224] ss:$8 sps:$4 sm:$0xff]   ;;  %p1608_p12 = scmp.ne.s32.totalorder %s2017_s9, %s1607_s29 }
  0x8d   : > { %719 = vmatprep.subr.bf16.mxu1 %v1412_v25  ;;  %v1475_v15 = vld [vmem:[%s1903_s4 + $0x220] ss:$8 sps:$4 sm:$0xff]   ;;  %v1480_v16 = vld [vmem:[%s1903_s4 + $0x234] ss:$8 sps:$4 sm:$0xff]   ;;  %v1478_v17 = vld [vmem:[%s1903_s4 + $0x230] ss:$8 sps:$4 sm:$0xff]  }
  0x8e   : > { %v1483_v18 = vld [vmem:[%s1903_s4 + $0x244] ss:$8 sps:$4 sm:$0xff]   ;;  %v1481_v19 = vld [vmem:[%s1903_s4 + $0x240] ss:$8 sps:$4 sm:$0xff]   ;;  %v1486_v20 = vld [vmem:[%s1903_s4 + $0x254] ss:$8 sps:$4 sm:$0xff]  }
  0x8f   : > { %477 = vmatpush1.bf16.msra.mxu0 %v1411_v26  ;;  %v1484_v21 = vld [vmem:[%s1903_s4 + $0x250] ss:$8 sps:$4 sm:$0xff]   ;;  %v1489_v22 = vld [vmem:[%s1903_s4 + $0x264] ss:$8 sps:$4 sm:$0xff]   ;;  %v1487_v23 = vld [vmem:[%s1903_s4 + $0x260] ss:$8 sps:$4 sm:$0xff]  }
  0x90   : > { %478 = vmatprep.subr.bf16.mxu0 %v1415_v27  ;;  %720 = vmatpush1.bf16.msra.mxu1 %v1414_v28  ;;  %v1492_v24 = vld [vmem:[%s1903_s4 + $0x274] ss:$8 sps:$4 sm:$0xff]   ;;  %v1490_v25 = vld [vmem:[%s1903_s4 + $0x270] ss:$8 sps:$4 sm:$0xff]   ;;  %v1495_v26 = vld [vmem:[%s1903_s4 + $0x284] ss:$8 sps:$4 sm:$0xff]  }
  0x91   : > { %721 = vmatprep.subr.bf16.mxu1 %v1418_v29  ;;  %v1493_v27 = vld [vmem:[%s1903_s4 + $0x280] ss:$8 sps:$4 sm:$0xff]   ;;  %v1498_v28 = vld [vmem:[%s1903_s4 + $0x294] ss:$8 sps:$4 sm:$0xff]   ;;  %v1496_v29 = vld [vmem:[%s1903_s4 + $0x290] ss:$8 sps:$4 sm:$0xff]  }
  0x92   : > { %p2073_p5 = scmp.ne.s32.totalorder %s2065_s23, 0  ;;  %s1686_s11 = smov [#allocation8]  }
  0x93   : > { %479 = vmatpush1.bf16.msra.mxu0 %v1417_v30  ;;  %v1501_v30 = vld [vmem:[%s1903_s4 + $0x2a4] ss:$8 sps:$4 sm:$0xff]   ;;  %s1611_s27 = sshll.u32 %s1686_s11, 4  ;;  %s1612_s27 = int_to_ptr.vmem [resolvable:$false] %s1611_s27 }
  0x94   : > { %480 = vmatprep.subr.bf16.mxu0 %v1421_v31  ;;  %722 = vmatpush1.bf16.msra.mxu1 %v1420_v32  ;;  %v1499_v31 = vld [vmem:[%s1903_s4 + $0x2a0] ss:$8 sps:$4 sm:$0xff]   ;;  %v1504_v32 = vld [vmem:[%s1903_s4 + $0x2b4] ss:$8 sps:$4 sm:$0xff]   ;;  %p1609_p13 = pnand %p1608_p12, %p2073_p5  ;;  %s1613_s25 = scalar_lea.vmem %s1612_s27, 512 }
  0x95   : > { %723 = vmatprep.subr.bf16.mxu1 %v1424_v33  ;;  %v1502_v33 = vld [vmem:[%s1903_s4 + $0x2b0] ss:$8 sps:$4 sm:$0xff]   ;;  %p1614_p11 = scmp.lt.s32.totalorder %s2017_s9, %s1612_s27  ;;  %p1615_p3 = scmp.lt.s32.totalorder %s1613_s25, %s1607_s29 }
  0x96   : > { %p1610_p6 = pneg %p1609_p13 }
  0x97   : > { %481 = vmatpush1.bf16.msra.mxu0 %v1423_v34  ;;  %v1507_v34 = vld [vmem:[%s1903_s4 + $0x2c4] ss:$8 sps:$4 sm:$0xff]   ;;  %p1616_p8 = por %p1615_p3, %p1614_p11 }
  0x98   : > { %482 = vmatprep.subr.bf16.mxu0 %v1427_v35  ;;  %724 = vmatpush1.bf16.msra.mxu1 %v1426_v36  ;;  %v1505_v35 = vld [vmem:[%s1903_s4 + $0x2c0] ss:$8 sps:$4 sm:$0xff]   ;;  %v1510_v36 = vld [vmem:[%s1903_s4 + $0x2d4] ss:$8 sps:$4 sm:$0xff]  }
  0x99   : > { %725 = vmatprep.subr.bf16.mxu1 %v1430_v37  ;;  %v1508_v37 = vld [vmem:[%s1903_s4 + $0x2d0] ss:$8 sps:$4 sm:$0xff]   ;;  %p1617_p9 = pnand %p1616_p8, %p1610_p6 }
  0x9b   : > { %483 = vmatpush1.bf16.msra.mxu0 %v1429_v38  ;;  %v1513_v38 = vld [vmem:[%s1903_s4 + $0x2e4] ss:$8 sps:$4 sm:$0xff]  }
  0x9c   : > { %484 = vmatprep.subr.bf16.mxu0 %v1433_v39  ;;  %726 = vmatpush1.bf16.msra.mxu1 %v1432_v40  ;;  %v1511_v39 = vld [vmem:[%s1903_s4 + $0x2e0] ss:$8 sps:$4 sm:$0xff]   ;;  %v1516_v40 = vld [vmem:[%s1903_s4 + $0x2f4] ss:$8 sps:$4 sm:$0xff]  }
  0x9d   : > { %727 = vmatprep.subr.bf16.mxu1 %v1436_v41  ;;  %v1514_v41 = vld [vmem:[%s1903_s4 + $0x2f0] ss:$8 sps:$4 sm:$0xff]  }
  0x9f   : > { %485 = vmatpush1.bf16.msra.mxu0 %v1435_v42  ;;  %v1234_v42 = vld [vmem:[%s1896_s20 + $0x20] sm:$0xff] }
  0xa0   : > { %486 = vmatprep.subr.bf16.mxu0 %v1439_v43  ;;  %728 = vmatpush1.bf16.msra.mxu1 %v1438_v44  ;;  %v755_v43 = vpack.c.bf16 %v1234_v42, %v1234_v42  ;;  %v264_v44 = vld [vmem:[%s1888_s30] sm:$0xff] }
  0xa1   : > { %729 = vmatprep.subr.bf16.mxu1 %v1442_v45  ;;  %v265_v45 = vld [vmem:[%s1888_s30 + $0x8] sm:$0xff]  ;;  %v266_v46 = vmul.f32 0.4, %v264_v44 }
  0xa2   : > { %v267_v48 = vmul.f32 0.4, %v265_v45 }
  0xa3   : > { %487 = vmatpush1.bf16.msra.mxu0 %v1441_v47 }
  0xa4   : > { %488 = vmatprep.subr.bf16.mxu0 %v1445_v49  ;;  %730 = vmatpush1.bf16.msra.mxu1 %v1444_v51 }
  0xa5   : > { %731 = vmatprep.subr.bf16.mxu1 %v1448_v53 }
  0xa7   : > { %489 = vmatpush1.bf16.msra.mxu0 %v1447_v54 }
  0xa8   : > { %490 = vmatprep.subr.bf16.mxu0 %v1451_v55  ;;  %732 = vmatpush1.bf16.msra.mxu1 %v1450_v56 }
  0xa9   : > { %733 = vmatprep.subr.bf16.mxu1 %v1454_v57 }
  0xab   : > { %491 = vmatpush1.bf16.msra.mxu0 %v1453_v58 }
  0xac   : > { %492 = vmatprep.subr.bf16.mxu0 %v1457_v59  ;;  %734 = vmatpush1.bf16.msra.mxu1 %v1456_v60 }
  0xad   : > { %735 = vmatprep.subr.bf16.mxu1 %v1460_v61 }
  0xaf   : > { %493 = vmatpush1.bf16.msra.mxu0 %v1459_v62 }
  0xb0   : > { %494 = vmatprep.subr.bf16.mxu0 %v1463_v63  ;;  %736 = vmatpush1.bf16.msra.mxu1 %v1462_v0 }
  0xb1   : > { %737 = vmatprep.subr.bf16.mxu1 %v1466_v2 }
  0xb3   : > { %495 = vmatpush1.bf16.msra.mxu0 %v1465_v1 }
  0xb4   : > { %950 = vmatprep.subr.bf16.mxu0 %v1471_v5  ;;  %738 = vmatpush1.bf16.msra.mxu1 %v1468_v3 }
  0xb6   : > { %497 = vmatmul.mubr.bf16.vlgmr.msra.gmra.mrb[0].mxu0 %v270_v7 }
  0xb7   : > { %951 = vmatpush1.bf16.msra.mxu0 %v1469_v8  ;;  %740 = vmatmul.mubr.bf16.vlgmr.msra.gmra.mrb[0].mxu1 %v512_v9 }
  0xb8   : > { %952 = vmatprep.subr.bf16.mxu0 %v1474_v10  ;;  %982 = vmatprep.mubr.bf16.mxu0 %v756_v12 }
  0xbb   : > { %953 = vmatpush1.bf16.msra.mxu0 %v1472_v13 }
  0xbc   : > { %954 = vmatprep.subr.bf16.mxu0 %v1477_v14 }
  0xbf   : > { %955 = vmatpush1.bf16.msra.mxu0 %v1475_v15 }
  0xc0   : > { %956 = vmatprep.subr.bf16.mxu0 %v1480_v16 }
  0xc3   : > { %957 = vmatpush1.bf16.msra.mxu0 %v1478_v17 }
  0xc4   : > { %958 = vmatprep.subr.bf16.mxu0 %v1483_v18 }
  0xc7   : > { %959 = vmatpush1.bf16.msra.mxu0 %v1481_v19 }
  0xc8   : > { %960 = vmatprep.subr.bf16.mxu0 %v1486_v20 }
  0xcb   : > { %961 = vmatpush1.bf16.msra.mxu0 %v1484_v21 }
  0xcc   : > { %962 = vmatprep.subr.bf16.mxu0 %v1489_v22 }
  0xcf   : > { %963 = vmatpush1.bf16.msra.mxu0 %v1487_v23 }
  0xd0   : > { %964 = vmatprep.subr.bf16.mxu0 %v1492_v24 }
  0xd3   : > { %965 = vmatpush1.bf16.msra.mxu0 %v1490_v25 }
  0xd4   : > { %966 = vmatprep.subr.bf16.mxu0 %v1495_v26 }
  0xd7   : > { %967 = vmatpush1.bf16.msra.mxu0 %v1493_v27 }
  0xd8   : > { %968 = vmatprep.subr.bf16.mxu0 %v1498_v28 }
  0xdb   : > { %969 = vmatpush1.bf16.msra.mxu0 %v1496_v29 }
  0xdc   : > { %970 = vmatprep.subr.bf16.mxu0 %v1501_v30 }
  0xdf   : > { %971 = vmatpush1.bf16.msra.mxu0 %v1499_v31 }
  0xe0   : > { %972 = vmatprep.subr.bf16.mxu0 %v1504_v32 }
  0xe3   : > { %973 = vmatpush1.bf16.msra.mxu0 %v1502_v33 }
  0xe4   : > { %974 = vmatprep.subr.bf16.mxu0 %v1507_v34 }
  0xe7   : > { %975 = vmatpush1.bf16.msra.mxu0 %v1505_v35 }
  0xe8   : > { %976 = vmatprep.subr.bf16.mxu0 %v1510_v36 }
  0xeb   : > { %977 = vmatpush1.bf16.msra.mxu0 %v1508_v37 }
  0xec   : > { %978 = vmatprep.subr.bf16.mxu0 %v1513_v38 }
  0xef   : > { %979 = vmatpush1.bf16.msra.mxu0 %v1511_v39 }
  0xf0   : > { %980 = vmatprep.subr.bf16.mxu0 %v1516_v40 }
  0xf3   : > { %981 = vmatpush1.bf16.msra.mxu0 %v1514_v41 }
  0xf6   : > { %983 = vmatmul.mubr.bf16.vlgmr.msra.gmra.mrb[4].mxu0 %v755_v43 }
 0x189   : > { %v498_v47 = vpop.f32.mrb[0].mxu0 }
 0x18a   : > { %v505_v49 = vmul.f32 0.2, %v498_v47  ;;  %v500_v50 = vpop.f32.mrb[1].mxu0  ;;  %v741_v53 = vpop.f32.mrb[0].mxu1 }
 0x18b   : > { %v506_v51 = vmul.f32 0.2, %v500_v50  ;;  %v502_v52 = vpop.f32.mrb[2].mxu0  ;;  %v748_v55 = vmul.f32 0.2, %v741_v53  ;;  %v743_v57 = vpop.f32.mrb[1].mxu1 }
 0x18c   : > { %v507_v54 = vadd.f32 %v505_v49, %v266_v46  ;;  %v503_v56 = vpop.f32.mrb[3].mxu0  ;;  %v749_v59 = vmul.f32 0.2, %v743_v57  ;;  %v745_v60 = vpop.f32.mrb[2].mxu1 }
 0x18d   : > { %v508_v58 = vadd.f32 %v506_v51, %v267_v48  ;;  %v746_v62 = vpop.f32.mrb[3].mxu1 }
 0x18e   : > { %v750_v61 = vadd.f32 %v748_v55, %v507_v54 }
 0x18f   : > { %v751_v63 = vadd.f32 %v749_v59, %v508_v58 }
 0x1c9   : > { %v984_v0 = vpop.f32.mrb[4].mxu0 }
 0x1ca   : > { %v991_v1 = vmul.f32 0.2, %v984_v0  ;;  %v986_v2 = vpop.f32.mrb[5].mxu0 }
 0x1cb   : > { %v992_v3 = vmul.f32 0.2, %v986_v2  ;;  %v988_v4 = vpop.f32.mrb[6].mxu0 }
 0x1cc   : > { %v993_v5 = vadd.f32 %v991_v1, %v750_v61  ;;  %v989_v6 = vpop.f32.mrb[7].mxu0 }
 0x1cd   : > { %v994_v7 = vadd.f32 %v992_v3, %v751_v63 }
 0x1ce   : > { %995 = vst [vmem:[%s263_s7] sm:$0xff] %v993_v5 }
 0x1cf   : > { %996 = vst [vmem:[%s263_s7 + $0x8] sm:$0xff] %v994_v7 }
 0x1d0   : > { %1620 = shalt.err (!%p1617_p9)
}
 0x1d1   : > { %s1621_s10 = scalar_lea.hbm %s2015_s28, 256  ;;  %s1625_s8 = scalar_lea.hbm %s2061_s3, 1024 }
 0x1d2   : > { %p1622_p10 = scmp.ne.s32.totalorder %s2015_s28, %s1621_s10  ;;  %p1626_p4 = scmp.lt.u32.totalorder %s2015_s28, %s2061_s3 }
 0x1d3   : > { %p1627_p1 = scmp.lt.u32.totalorder %s1625_s8, %s1621_s10  ;;  %p1629_p12 = scmp.lt.u32.totalorder %s1621_s10, %s2015_s28 }
 0x1d4   : > { %p1623_p7 = pnand %p1622_p10, %p2073_p5 }
 0x1d5   : > { %p1628_p0 = por %p1627_p1, %p1626_p4 }
 0x1d6   : > { %p1624_p2 = pneg %p1623_p7 }
 0x1d7   : > { %p1630_p13 = por %p1629_p12, %p1628_p0 }
 0x1d9   : > { %p1631_p6 = pnand %p1630_p13, %p1624_p2 }
 0x1db   : > { %1634 = shalt.err (!%p1631_p6)
}
 0x1dc   : > { %1319 = dma.vmem_to_hbm [thread:$0]  (%p2073_p5), %s2017_s9, 256, %s2015_s28, %s998_s16  }
 0x1dd PF: > { %p1336_p11 = scmp.ge.s32.totalorder %s1677_s15, 2  ;;  %s1024_s6 = sand.u32 1, %s1665_s12  }
 0x1de   : > { %p2074_p3 = scmp.ne.s32.totalorder %s2066_s24, 0  ;;  %s1025_s4 = scalar_lea.sflag [#allocation4], %s1024_s6 }
 0x1e0   : > { %p1332_p8 = pnand %p1336_p11, %p2074_p3 }
 0x1e2   : > { %1660 = dma.done.wait (!%p1332_p8), %s1025_s4, 256  }
 0x1e3   : > { %1662 = vsyncadd (!%p1332_p8), %s1025_s4, 4294967040  ;;  %p19_p9 = scmp.ge.s32.totalorder %s1732_s18, 6   ;;  %s2075_s12 = smov %s1669_s13 }
 0x1e4   : > { %s2076_s13 = smov %s1673_s14  ;;  %s2077_s14 = smov %s1744_s21 }
 0x1e5   : > { %s2078_s15 = smov %s1732_s18  ;;  %21 = sbr.rel (!%p19_p9) target bundleno = 7 (0x7), region = 105 }
 0x1ec   :  { %1030 = vsyncpa [#allocation3], 1 }
 0x1ed   :  { %1032 = vsyncpa [#allocation3 + $0x1], 1 }
 0x1ee   :  { %1033 = vsyncpa [#allocation6], 1 }
 0x1ef   :  { %1035 = vsyncpa [#allocation6 + $0x1], 1 }
 0x1f0   :  { %1036 = vsyncpa [#allocation4], 1 }
 0x1f1   :  { %1038 = vsyncpa [#allocation4 + $0x1], 1 }

</bundles_post_ra>
